<compile_context>
chip_gen: v7x
topology: tpu7x:2x2x1
jax: 0.10.0
libtpu: 0.0.40
codegen_flags: <defaults>
</compile_context>

<pallas_src>
import jax
import jax.numpy as jnp
from jax import lax
from jax.experimental import pallas as pl
from jax.experimental.pallas import tpu as pltpu


def _attn_kernel(x_ref, t_ref, v_ref, cc_ref, wo_ref, bo_ref, o_ref):
    """One (batch b, query-tile q) grid step.

    x_ref : (1, C, tq)   query tile of the input (also the residual)
    t_ref : (1, C, L)    T  = scale * Wq^T Wk @ X    (per-batch, resident)
    v_ref : (1, C, L)    V  = Wv @ X + bv            (per-batch, resident)
    cc_ref: (1, 1, L)    cc = scale * (bq^T Wk) @ X  (per-batch, resident)
    wo_ref: (C, C)       output projection weight
    bo_ref: (C, 1) f32   output projection bias
    o_ref : (1, C, tq)   output tile
    """
    op_dtype = x_ref.dtype
    xq = x_ref[0]                                                  # (C, tq)

    # scores (tq, L): full-depth-C contraction (reassociated; scale and the
    # q/k biases already folded into T / cc).
    s = lax.dot_general(xq, t_ref[0], (((0,), (0,)), ((), ())),
                        preferred_element_type=jnp.float32)        # (tq, L)
    s = s + cc_ref[0]                                              # (1, L) bcast

    # Unnormalized softmax along the length (lane) axis.
    s = s - jnp.max(s, axis=-1, keepdims=True)
    p = jnp.exp(s)                                                 # (tq, L) f32
    denom = jnp.sum(p, axis=-1, keepdims=True)                     # (tq, 1) f32

    # out (tq, C) = p @ V^T — normalize AFTER the PV matmul: tq*C multiplies
    # instead of tq*L, and the reciprocal is exact on a tiny vector.
    out_qc = lax.dot_general(p.astype(op_dtype), v_ref[0],
                             (((1,), (1,)), ((), ())),
                             preferred_element_type=jnp.float32)   # (tq, C)
    out_qc = out_qc * (1.0 / denom)                                # exact, (tq,1) bcast

    # Output projection (C, tq) = Wo @ out^T, then bias + residual.
    y = lax.dot_general(wo_ref[...], out_qc.astype(op_dtype),
                        (((1,), (1,)), ((), ())),
                        preferred_element_type=jnp.float32)        # (C, tq)
    y = y + bo_ref[...] + xq
    o_ref[0] = y.astype(o_ref.dtype)


def _choose_q_tile(L, C, itemsize, target=512, score_budget_bytes=16 << 20):
    """Largest 128-multiple query tile dividing L (<= target); shrinks if the
    f32 (tq, L) score tile would be too large. Falls back to tq = L for short
    or non-128-aligned lengths (caller beware for long odd L)."""
    if L % 128 != 0 or L <= target:
        return L
    candidates = [t for t in range(128, target + 1, 128) if L % t == 0]
    tq = max(candidates)
    while tq > 128 and tq * L * 4 > score_budget_bytes:
        smaller = [t for t in candidates if t < tq]
        if not smaller:
            break
        tq = max(smaller)
    return tq


def _vmem_limit_bytes(C, L, tq, itemsize):
    """Scoped-VMEM budget derived from the shapes; clamped to v7x's 64 MiB/TC."""
    need = (
        2 * C * tq * itemsize        # x query tile (double-buffered)
        + 2 * 2 * C * L * itemsize   # T, V per-batch slabs (double-buffered)
        + 2 * L * 4                  # cc
        + 2 * C * tq * itemsize      # output tile
        + 2 * (C * C + C) * itemsize  # Wo, bo
        + 4 * tq * L * 4             # f32 score/exp temps + headroom
        + (2 << 20)
    )
    return int(min(max(need, 16 << 20), 64 << 20))


def self_attention_pallas(x_ncl, params, *, reduction=8, q_tile_target=512,
                          mxu_dtype=None):
    """x_ncl: (B, C, L); params: dict of Conv1d weights/biases (PyTorch layout).

    mxu_dtype: optional lower-precision MXU operand dtype (e.g. jnp.bfloat16)
    for f32 inputs; default None keeps the input dtype (exact path).
    """
    B, C, L = x_ncl.shape
    Cr = C // reduction
    scale = float(Cr) ** (-0.5)
    op_dtype = x_ncl.dtype if mxu_dtype is None else mxu_dtype
    itemsize = jnp.dtype(op_dtype).itemsize
    f32 = jnp.float32
    hi = jax.lax.Precision.HIGHEST

    wq = params["wq"][:, :, 0].astype(f32)    # (Cr, C)
    wk = params["wk"][:, :, 0].astype(f32)    # (Cr, C)
    bq = params["bq"].astype(f32)             # (Cr,)
    wv = params["wv"][:, :, 0].astype(f32)    # (C, C)
    bv = params["bv"].astype(f32)             # (C,)
    wo = params["wo"][:, :, 0]                # (C, C)
    bo = params["bo"].astype(f32)             # (C,)

    # Reassociated score weights:
    #   softmax(Q^T K * s) == softmax(X^T (s Wq^T Wk) X + 1 ⊗ (s bq^T Wk) X)
    # (terms constant along the softmax axis drop out).
    m_mat = scale * (wq.T @ wk)               # (C, C)
    w_vec = scale * (bq @ wk)                 # (C,)

    # Per-batch key-side projections, hoisted out of the kernel (plain XLA
    # matmuls): the kernel carries no scratch state, both grid axes are
    # 'parallel', and the projections overlap/pipeline normally.
    xf = x_ncl.astype(f32)
    t_all = jnp.einsum("cd,bdl->bcl", m_mat, xf, precision=hi).astype(op_dtype)
    v_all = (jnp.einsum("cd,bdl->bcl", wv, xf, precision=hi)
             + bv[None, :, None]).astype(op_dtype)
    cc_all = jnp.einsum("c,bcl->bl", w_vec, xf, precision=hi)[:, None, :]  # (B,1,L) f32

    tq = _choose_q_tile(L, C, itemsize, target=q_tile_target)
    nq = L // tq

    x_op = x_ncl.astype(op_dtype)
    wo_op = wo.astype(op_dtype)
    bo_col = bo.reshape(C, 1)

    return pl.pallas_call(
        _attn_kernel,
        out_shape=jax.ShapeDtypeStruct((B, C, L), x_ncl.dtype),
        grid_spec=pltpu.PrefetchScalarGridSpec(
            num_scalar_prefetch=0,
            grid=(B, nq),
            in_specs=[
                pl.BlockSpec((1, C, tq), lambda b, q: (b, 0, q)),  # x query tile
                pl.BlockSpec((1, C, L), lambda b, q: (b, 0, 0)),   # T (resident per b)
                pl.BlockSpec((1, C, L), lambda b, q: (b, 0, 0)),   # V (resident per b)
                pl.BlockSpec((1, 1, L), lambda b, q: (b, 0, 0)),   # cc
                pl.BlockSpec((C, C), lambda b, q: (0, 0)),         # Wo
                pl.BlockSpec((C, 1), lambda b, q: (0, 0)),         # bo
            ],
            out_specs=pl.BlockSpec((1, C, tq), lambda b, q: (b, 0, q)),
        ),
        compiler_params=pltpu.CompilerParams(
            dimension_semantics=("parallel", "parallel"),
            vmem_limit_bytes=_vmem_limit_bytes(C, L, tq, itemsize),
        ),
    )(x_op, t_all, v_all, cc_all, wo_op, bo_col)


def _reference(x_ncl, params, *, reduction=8):
    """Plain-JAX reference replicating the PyTorch forward exactly."""
    B, C, L = x_ncl.shape
    Cr = C // reduction
    scale = float(Cr) ** (-0.5)

    def conv1x1(x, w, b):  # x: (B, Cin, L), w: (Cout, Cin, 1), b: (Cout,)
        return jnp.einsum("oc,bcl->bol", w[:, :, 0], x) + b[None, :, None]

    q = conv1x1(x_ncl, params["wq"], params["bq"])      # (B, Cr, L)
    k = conv1x1(x_ncl, params["wk"], params["bk"])      # (B, Cr, L)
    v = conv1x1(x_ncl, params["wv"], params["bv"])      # (B, C, L)
    qt = jnp.transpose(q, (0, 2, 1))                    # (B, L, Cr)
    attn = jnp.einsum("bld,bdm->blm", qt, k) * scale    # (B, L, L)
    attn = jax.nn.softmax(attn, axis=-1)
    out = jnp.einsum("blm,bmc->blc", attn, jnp.transpose(v, (0, 2, 1)))
    out = jnp.transpose(out, (0, 2, 1))                 # (B, C, L)
    out = conv1x1(out, params["wo"], params["bo"])
    return out + x_ncl


def make_params(key, channels, reduction=8, dtype=jnp.float32):
    Cr = channels // reduction
    ks = jax.random.split(key, 8)
    scale_in = 1.0 / jnp.sqrt(channels)
    return {
        "wq": jax.random.normal(ks[0], (Cr, channels, 1), dtype) * scale_in,
        "bq": jax.random.normal(ks[1], (Cr,), dtype) * 0.01,
        "wk": jax.random.normal(ks[2], (Cr, channels, 1), dtype) * scale_in,
        "bk": jax.random.normal(ks[3], (Cr,), dtype) * 0.01,
        "wv": jax.random.normal(ks[4], (channels, channels, 1), dtype) * scale_in,
        "bv": jax.random.normal(ks[5], (channels,), dtype) * 0.01,
        "wo": jax.random.normal(ks[6], (channels, channels, 1), dtype) * scale_in,
        "bo": jax.random.normal(ks[7], (channels,), dtype) * 0.01,
    }


if __name__ == "__main__":
    # Make the pure-JAX reference an honest f32 baseline (XLA's default f32
    # matmul precision on TPU is reduced and would dominate the error budget).
    jax.config.update("jax_default_matmul_precision", "highest")

    key = jax.random.PRNGKey(0)

    # (B, C, L, q_tile_target):
    #   case 1: short, non-128-aligned L -> single q tile (tq = L)
    #   case 2: L = 384 with a 128 target -> tq = 128, nq = 3 (multi-tile path,
    #           T/V stay resident across q tiles of each batch element)
    cases = [
        (2, 32, 16, 512),
        (2, 64, 384, 128),
    ]
    for (B, C, L, q_target) in cases:
        k_x, k_p, key = jax.random.split(key, 3)
        x = jax.random.normal(k_x, (B, C, L), jnp.float32)
        params = make_params(k_p, C, reduction=8)

        out = jax.block_until_ready(
            self_attention_pallas(x, params, reduction=8, q_tile_target=q_target))
        ref = _reference(x, params, reduction=8)

        assert out.shape == (B, C, L)
        err = float(jnp.max(jnp.abs(out - ref)))
        assert jnp.allclose(out, ref, atol=2e-3, rtol=2e-3), \
            f"mismatch for shape {(B, C, L)}: max abs err {err}"

    print("KERNEL_OK")
</pallas_src>

<mosaic_0001>
module attributes {stable_mosaic.version = 11 : i64} {
  func.func @_attn_kernel(%arg0: i32, %arg1: i32, %arg2: memref<1x32x16xf32, #tpu.memory_space<vmem>>, %arg3: memref<1x32x16xf32, #tpu.memory_space<vmem>>, %arg4: memref<1x32x16xf32, #tpu.memory_space<vmem>>, %arg5: memref<1x1x16xf32, #tpu.memory_space<vmem>>, %arg6: memref<32x32xf32, #tpu.memory_space<vmem>>, %arg7: memref<32x1xf32, #tpu.memory_space<vmem>>, %arg8: memref<1x32x16xf32, #tpu.memory_space<vmem>>) attributes {dimension_semantics = [#tpu.dimension_semantics<parallel>, #tpu.dimension_semantics<parallel>], iteration_bounds = array<i64: 2, 1>, scalar_prefetch = 0 : i64, scratch_operands = 0 : i64, tpu.core_type = #tpu.core_type<tc>, window_params = [{transform_indices = @transform_0, window_bounds = array<i64: 1, 32, 16>}, {transform_indices = @transform_1, window_bounds = array<i64: 1, 32, 16>}, {transform_indices = @transform_2, window_bounds = array<i64: 1, 32, 16>}, {transform_indices = @transform_3, window_bounds = array<i64: 1, 1, 16>}, {pipeline_mode = #tpu.pipeline_mode<synchronous>, transform_indices = @transform_4, window_bounds = array<i64: 32, 32>}, {pipeline_mode = #tpu.pipeline_mode<synchronous>, transform_indices = @transform_5, window_bounds = array<i64: 32, 1>}, {transform_indices = @transform_6, window_bounds = array<i64: 1, 32, 16>}]} {
    %c0 = arith.constant 0 : index
    %c0_0 = arith.constant 0 : index
    %c0_1 = arith.constant 0 : index
    %0 = vector.load %arg2[%c0, %c0_0, %c0_1] : memref<1x32x16xf32, #tpu.memory_space<vmem>>, vector<1x32x16xf32>
    %1 = vector.shape_cast %0 : vector<1x32x16xf32> to vector<32x16xf32>
    %c0_2 = arith.constant 0 : index
    %c0_3 = arith.constant 0 : index
    %c0_4 = arith.constant 0 : index
    %2 = vector.load %arg3[%c0_2, %c0_3, %c0_4] : memref<1x32x16xf32, #tpu.memory_space<vmem>>, vector<1x32x16xf32>
    %3 = vector.shape_cast %2 : vector<1x32x16xf32> to vector<32x16xf32>
    %cst = arith.constant dense<0.000000e+00> : vector<16x16xf32>
    %4 = tpu.matmul %1, %3, %cst {dimension_numbers = #tpu.dot_dimension_numbers<[0], [0], [1], [1], [0, 1, 1, 1], [], []>, precision = #tpu.contract_precision<fp32>} : vector<32x16xf32>, vector<32x16xf32>, vector<16x16xf32> -> vector<16x16xf32>
    %c0_5 = arith.constant 0 : index
    %c0_6 = arith.constant 0 : index
    %c0_7 = arith.constant 0 : index
    %5 = vector.load %arg5[%c0_5, %c0_6, %c0_7] : memref<1x1x16xf32, #tpu.memory_space<vmem>>, vector<1x1x16xf32>
    %6 = vector.shape_cast %5 : vector<1x1x16xf32> to vector<1x16xf32>
    %7 = vector.broadcast %6 : vector<1x16xf32> to vector<16x16xf32>
    %8 = arith.addf %4, %7 : vector<16x16xf32>
    %cst_8 = arith.constant dense<0xFF800000> : vector<16xf32>
    %9 = vector.multi_reduction <maximumf>, %8, %cst_8 [1] : vector<16x16xf32> to vector<16xf32>
    %10 = vector.shape_cast %9 : vector<16xf32> to vector<16x1xf32>
    %11 = vector.broadcast %10 : vector<16x1xf32> to vector<16x16xf32>
    %12 = arith.subf %8, %11 : vector<16x16xf32>
    %13 = math.exp %12 : vector<16x16xf32>
    %cst_9 = arith.constant dense<0.000000e+00> : vector<16xf32>
    %14 = vector.multi_reduction <add>, %13, %cst_9 [1] : vector<16x16xf32> to vector<16xf32>
    %15 = vector.shape_cast %14 : vector<16xf32> to vector<16x1xf32>
    %c0_10 = arith.constant 0 : index
    %c0_11 = arith.constant 0 : index
    %c0_12 = arith.constant 0 : index
    %16 = vector.load %arg4[%c0_10, %c0_11, %c0_12] : memref<1x32x16xf32, #tpu.memory_space<vmem>>, vector<1x32x16xf32>
    %17 = vector.shape_cast %16 : vector<1x32x16xf32> to vector<32x16xf32>
    %cst_13 = arith.constant dense<0.000000e+00> : vector<16x32xf32>
    %18 = tpu.matmul %13, %17, %cst_13 {dimension_numbers = #tpu.dot_dimension_numbers<[1], [1], [0], [0], [0, 0, 1, 0], [], []>, precision = #tpu.contract_precision<fp32>} : vector<16x16xf32>, vector<32x16xf32>, vector<16x32xf32> -> vector<16x32xf32>
    %cst_14 = arith.constant 1.000000e+00 : f32
    %19 = vector.broadcast %cst_14 : f32 to vector<16x1xf32>
    %20 = arith.divf %19, %15 : vector<16x1xf32>
    %21 = vector.broadcast %20 : vector<16x1xf32> to vector<16x32xf32>
    %22 = arith.mulf %18, %21 : vector<16x32xf32>
    %c0_15 = arith.constant 0 : index
    %c0_16 = arith.constant 0 : index
    %23 = vector.load %arg6[%c0_15, %c0_16] : memref<32x32xf32, #tpu.memory_space<vmem>>, vector<32x32xf32>
    %cst_17 = arith.constant dense<0.000000e+00> : vector<32x16xf32>
    %24 = tpu.matmul %23, %22, %cst_17 {dimension_numbers = #tpu.dot_dimension_numbers<[1], [1], [0], [0], [0, 0, 1, 0], [], []>, precision = #tpu.contract_precision<fp32>} : vector<32x32xf32>, vector<16x32xf32>, vector<32x16xf32> -> vector<32x16xf32>
    %c0_18 = arith.constant 0 : index
    %c0_19 = arith.constant 0 : index
    %25 = vector.load %arg7[%c0_18, %c0_19] : memref<32x1xf32, #tpu.memory_space<vmem>>, vector<32x1xf32>
    %26 = vector.broadcast %25 : vector<32x1xf32> to vector<32x16xf32>
    %27 = arith.addf %24, %26 : vector<32x16xf32>
    %28 = arith.addf %27, %1 : vector<32x16xf32>
    %c0_20 = arith.constant 0 : index
    %c0_21 = arith.constant 0 : index
    %c0_22 = arith.constant 0 : index
    %29 = vector.load %arg8[%c0_20, %c0_21, %c0_22] : memref<1x32x16xf32, #tpu.memory_space<vmem>>, vector<1x32x16xf32>
    %30 = vector.shape_cast %29 : vector<1x32x16xf32> to vector<32x16xf32>
    %31 = vector.shape_cast %28 : vector<32x16xf32> to vector<1x32x16xf32>
    tpu.vector_store %arg8[%c0_20, %c0_21, %c0_22], %31 {strides = array<i32>} : memref<1x32x16xf32, #tpu.memory_space<vmem>>, vector<1x32x16xf32>,
    return
  }
  func.func @transform_0(%arg0: i32, %arg1: i32) -> (i32, i32, i32) {
    %c0_i32 = arith.constant 0 : i32
    %c0_i32_0 = arith.constant 0 : i32
    return %arg0, %c0_i32, %arg1 : i32, i32, i32
  }
  func.func @transform_1(%arg0: i32, %arg1: i32) -> (i32, i32, i32) {
    %c0_i32 = arith.constant 0 : i32
    %c0_i32_0 = arith.constant 0 : i32
    %c0_i32_1 = arith.constant 0 : i32
    return %arg0, %c0_i32, %c0_i32_0 : i32, i32, i32
  }
  func.func @transform_2(%arg0: i32, %arg1: i32) -> (i32, i32, i32) {
    %c0_i32 = arith.constant 0 : i32
    %c0_i32_0 = arith.constant 0 : i32
    %c0_i32_1 = arith.constant 0 : i32
    return %arg0, %c0_i32, %c0_i32_0 : i32, i32, i32
  }
  func.func @transform_3(%arg0: i32, %arg1: i32) -> (i32, i32, i32) {
    %c0_i32 = arith.constant 0 : i32
    %c0_i32_0 = arith.constant 0 : i32
    %c0_i32_1 = arith.constant 0 : i32
    return %arg0, %c0_i32, %c0_i32_0 : i32, i32, i32
  }
  func.func @transform_4(%arg0: i32, %arg1: i32) -> (i32, i32) {
    %c0_i32 = arith.constant 0 : i32
    %c0_i32_0 = arith.constant 0 : i32
    %c0_i32_1 = arith.constant 0 : i32
    return %c0_i32, %c0_i32_0 : i32, i32
  }
  func.func @transform_5(%arg0: i32, %arg1: i32) -> (i32, i32) {
    %c0_i32 = arith.constant 0 : i32
    %c0_i32_0 = arith.constant 0 : i32
    %c0_i32_1 = arith.constant 0 : i32
    return %c0_i32, %c0_i32_0 : i32, i32
  }
  func.func @transform_6(%arg0: i32, %arg1: i32) -> (i32, i32, i32) {
    %c0_i32 = arith.constant 0 : i32
    %c0_i32_0 = arith.constant 0 : i32
    return %arg0, %c0_i32, %arg1 : i32, i32, i32
  }
}

</mosaic_0001>

<bundles_post_ra>
// kernel: tpu_custom_call.1
= control target key start
LH: loop header
LB: loop body
LE: loop exit
PB: predicated region body
PF: predicated region fallthrough
CT: control target
= control target key end

     0   :  { %s2834_s21 = smov 0   ;;  %s2836_s22 = smov 0   ;;  %s3007_s0 = inlined_call_operand.vmem [shape: f32[2,32,16], index: 0, kind: input, shape index: {}]   ;;  %s3008_s1 = inlined_call_operand.vmem [shape: f32[2,32,16], index: 1, kind: input, shape index: {}]   ;;  %s3009_s2 = inlined_call_operand.vmem [shape: f32[2,32,16], index: 2, kind: input, shape index: {}]   ;;  %s3010_s3 = inlined_call_operand.vmem [shape: f32[2,1,16], index: 3, kind: input, shape index: {}]   ;;  %s3011_s4 = inlined_call_operand.vmem [shape: f32[32,32], index: 4, kind: input, shape index: {}]   ;;  %s3012_s5 = inlined_call_operand.vmem [shape: f32[32,1], index: 5, kind: input, shape index: {}]   ;;  %s3013_s6 = inlined_call_operand.vmem [shape: f32[2,32,16], index: 6, kind: output, shape index: {}]  }
   0x1   :  { %s2838_s23 = smov 0  }
   0x2 LB: > { %s28_s24 = sadd.s32 1, %s2792_s22  ;;  %p2256_p0 = scmp.ge.s32.totalorder %s2796_s23, 1  ;;  %s2796_s23 = sphi %s2838_s23, %s16_s23   ;;  %s2792_s22 = sphi %s2836_s22, %s3015_s22   ;;  %s2788_s21 = sphi %s2834_s21, %s3014_s21  }
   0x3   : > { %p30_p1 = scmp.ge.s32.totalorder %s28_s24, 2  ;;  %p259_p2 = scmp.lt.s32.totalorder %s2796_s23, 3 }
   0x5   : > { %s3017_s24 = smov (%p30_p1, %s28_s24), 0  ;;  %p260_p3 = pnand %p2256_p0, %p259_p2 }
   0x6   : > { %p308_p4 = scmp.lt.s32.totalorder (!%p260_p3), %s2788_s21, 1  ;;  %vm384_vm0 = vcmask (!%p260_p3), 261120   ;;  %vm919_vm1 = vcmask (!%p260_p3), 130048  }
   0x7   : > { %263 = sbr.rel (%p260_p3) target bundleno = 1160 (0x488), region = 44 }
   0xe   : > { %s3019_s21 = smov (!%p308_p4, %s2788_s21), 1 }
   0xf   : > { %s2855_s25 = sshll.u32 %s3019_s21, 5  ;;  %s328_s10 = scalar_lea.vmem %s3010_s3, %s3019_s21 }
  0x10   : > { %s315_s28 = scalar_lea.vmem %s3007_s0, %s2855_s25  ;;  %s320_s7 = scalar_lea.vmem %s3008_s1, %s2855_s25  ;;  %v2265_v50 = vld [vmem:[%s328_s10] ss:$0 sm:$0xff] }
  0x11   : > { %v2865_v0 = vld [vmem:[%s315_s28] sm:$0xff]  ;;  %v342_v2 = vld [vmem:[%s320_s7 + $0x8] sm:$0xff]  ;;  %v343_v3 = vld [vmem:[%s320_s7 + $0x10] sm:$0xff]  ;;  %s325_s13 = scalar_lea.vmem %s3009_s2, %s2855_s25  ;;  %s336_s12 = scalar_lea.vmem %s3013_s6, %s2855_s25 }
  0x12   : > { %v341_v1 = vld [vmem:[%s320_s7] sm:$0xff]  ;;  %352 = vxpose.xlu0.b32.start [1/4] (short) (narrow) %v2865_v0, 16  ;;  %v395_v5 = vand.u32 4294901760, %v342_v2  ;;  %v2868_v6 = vld [vmem:[%s315_s28 + $0x8] sm:$0xff]  ;;  %v344_v7 = vld [vmem:[%s320_s7 + $0x18] sm:$0xff]  ;;  %v398_v8 = vand.u32 4294901760, %v343_v3 }
  0x13   : > { %v392_v4 = vand.u32 4294901760, %v341_v1  ;;  %v2871_v9 = vld [vmem:[%s315_s28 + $0x10] sm:$0xff]  ;;  %v401_v10 = vand.u32 4294901760, %v344_v7  ;;  %v2877_v16 = vld [vmem:[%s315_s28 + $0x18] sm:$0xff]  ;;  %v938_v57 = vld [vmem:[%s325_s13] sm:$0xff] }
  0x14   : > { %v489_v13 = vsub.f32 %v342_v2, %v395_v5  ;;  %v496_v20 = vsub.f32 %v343_v3, %v398_v8  ;;  %v939_v58 = vld [vmem:[%s325_s13 + $0x8] sm:$0xff]  ;;  %v949_v59 = vsel %vm919_vm1, %v938_v57, 0  ;;  %v941_v2 = vld [vmem:[%s325_s13 + $0x18] sm:$0xff] }
  0x15   : > { %v2873_v11 = vpack.c.bf16 %v395_v5, %v392_v4  ;;  %v482_v12 = vsub.f32 %v341_v1, %v392_v4  ;;  %v2880_v17 = vpack.c.bf16 %v401_v10, %v398_v8  ;;  %v503_v21 = vsub.f32 %v344_v7, %v401_v10  ;;  %v940_v1 = vld [vmem:[%s325_s13 + $0x10] sm:$0xff] }
  0x16   : > { %353 = vxpose.xlu0.b32.cont [2/4] (short) (narrow) %v2868_v6, 16  ;;  %v490_v15 = vand.u32 4294901760, %v489_v13  ;;  %v497_v24 = vand.u32 4294901760, %v496_v20  ;;  %v952_v60 = vsel %vm919_vm1, %v939_v58, 0  ;;  %v961_v61 = vand.u32 4294901760, %v949_v59 }
  0x17   : > { %2573 = vmatprep.subr.bf16.mxu0 %v2873_v11  ;;  %v483_v14 = vand.u32 4294901760, %v482_v12  ;;  %v504_v25 = vand.u32 4294901760, %v503_v21  ;;  %v2588_v32 = vpack.c.bf16 %v489_v13, %v482_v12  ;;  %v2592_v33 = vpack.c.bf16 %v503_v21, %v496_v20 }
  0x18   : > { %2575 = vmatpush3.bf16.msra.mxu0 %v2873_v11  ;;  %v491_v19 = vsub.f32 %v489_v13, %v490_v15  ;;  %v498_v27 = vsub.f32 %v496_v20, %v497_v24  ;;  %v964_v62 = vand.u32 4294901760, %v952_v60  ;;  %v955_v3 = vsel %vm919_vm1, %v940_v1, 0  ;;  %v1498_v1 = vld [vmem:[%s3012_s5] sm:$0xff] }
  0x19   : > { %v484_v18 = vsub.f32 %v482_v12, %v483_v14  ;;  %2577 = vmatprep.subr.bf16.mxu0 %v2880_v17  ;;  %v505_v28 = vsub.f32 %v503_v21, %v504_v25  ;;  %v2604_v34 = vpack.c.bf16 %v490_v15, %v483_v14  ;;  %v2608_v35 = vpack.c.bf16 %v504_v25, %v497_v24 }
  0x1a   : > { %354 = vxpose.xlu0.b32.cont [3/4] (short) (narrow) %v2871_v9, 16  ;;  %v492_v23 = vand.u32 4294901760, %v491_v19  ;;  %v499_v29 = vand.u32 4294901760, %v498_v27  ;;  %v2907_v63 = vpack.c.bf16 %v964_v62, %v961_v61  ;;  %v958_v4 = vsel %vm919_vm1, %v941_v2, 0  ;;  %v1500_v2 = vld [vmem:[%s3012_s5 + $0x10] sm:$0xff] }
  0x1b   : > { %v485_v22 = vand.u32 4294901760, %v484_v18  ;;  %v506_v30 = vand.u32 4294901760, %v505_v28  ;;  %v967_v5 = vand.u32 4294901760, %v955_v3  ;;  %v970_v7 = vand.u32 4294901760, %v958_v4 }
  0x1c   : > { %2579 = vmatpush3.bf16.msra.mxu0 %v2880_v17  ;;  %2621 = vmatprep.subr.bf16.mxu1 %v2907_v63  ;;  %v1051_v10 = vsub.f32 %v949_v59, %v961_v61 }
  0x1d   : > { %v2580_v26 = vpack.c.bf16 %v492_v23, %v485_v22  ;;  %v2584_v31 = vpack.c.bf16 %v506_v30, %v499_v29  ;;  %2623 = vmatpush3.bf16.xpose.msra.mxu1 %v2907_v63  ;;  %v2913_v8 = vpack.c.bf16 %v970_v7, %v967_v5  ;;  %v1065_v20 = vsub.f32 %v955_v3, %v967_v5  ;;  %v1501_v3 = vld [vmem:[%s3012_s5 + $0x18] sm:$0xff] }
  0x1e   : > { %355 = vxpose.xlu0.b32.end [4/4] (short) (narrow) %v2877_v16, 16  ;;  %v1052_v12 = vand.u32 4294901760, %v1051_v10  ;;  %v1072_v21 = vsub.f32 %v958_v4, %v970_v7  ;;  %v1495_v7 = vld [vmem:[%s3011_s4 + $0x8] sm:$0xff] }
  0x1f   : > { %2581 = vmatprep.subr.bf16.mxu0 %v2580_v26  ;;  %2625 = vmatprep.subr.bf16.mxu1 %v2913_v8  ;;  %v1066_v22 = vand.u32 4294901760, %v1065_v20 }
  0x20   : > { %v1053_v14 = vsub.f32 %v1051_v10, %v1052_v12  ;;  %v1073_v23 = vand.u32 4294901760, %v1072_v21  ;;  %v2640_v30 = vpack.c.bf16 %v1072_v21, %v1065_v20 }
  0x21   : > { %v1067_v24 = vsub.f32 %v1065_v20, %v1066_v22 }
  0x22   : > { %v1074_v25 = vsub.f32 %v1072_v21, %v1073_v23 }
  0x24   : > { %v1075_v27 = vand.u32 4294901760, %v1074_v25 }
  0x25   : > { %2627 = vmatpush3.bf16.xpose.msra.mxu1 %v2913_v8 }
  0x92   : > { %v368_v36 = vpop.trf.xlu0 }
  0x93   : > { %v386_v37 = vsel %vm384_vm0, %v368_v36, 0 }
  0x94   : > { %v460_v38 = vand.u32 4294901760, %v386_v37 }
  0x96   : > { %v461_v39 = vsub.f32 %v386_v37, %v460_v38  ;;  %v369_v40 = vpop.trf.xlu0 }
  0x97   : > { %v389_v41 = vsel %vm384_vm0, %v369_v40, 0 }
  0x98   : > { %v470_v42 = vand.u32 4294901760, %v389_v41  ;;  %v462_v43 = vand.u32 4294901760, %v461_v39 }
  0x9a   : > { %v471_v44 = vsub.f32 %v389_v41, %v470_v42  ;;  %v463_v45 = vsub.f32 %v461_v39, %v462_v43 }
  0x9c   : > { %v472_v46 = vand.u32 4294901760, %v471_v44  ;;  %v464_v47 = vand.u32 4294901760, %v463_v45 }
  0x9e   : > { %2388 = vmatprep.mubr.f32.mxu0 %v464_v47  ;;  %v473_v48 = vsub.f32 %v471_v44, %v472_v46 }
  0xa0   : > { %v474_v49 = vand.u32 4294901760, %v473_v48 }
  0xa2   : > { %2389 = vmatmul.mubr.f32.vlgmr.msra.gmra.mrb[0].mxu0 %v474_v49 }
  0xa3   : > { %2583 = vmatpush3.bf16.msra.mxu0 %v2580_v26  ;;  %2399 = vmatprep.mubr.f32.mxu0 %v460_v38  ;;  %v1068_v26 = vand.u32 4294901760, %v1067_v24 }
  0xa4   : > { %2585 = vmatprep.subr.bf16.mxu0 %v2584_v31 }
  0xa5   : > { %v2632_v28 = vpack.c.bf16 %v1075_v27, %v1068_v26 }
  0xa7   : > { %2587 = vmatpush3.bf16.msra.mxu0 %v2584_v31 }
  0xa8   : > { %2589 = vmatprep.subr.bf16.mxu0 %v2588_v32 }
  0xaa   : > { %2400 = vmatmul.mubr.f32.vlgmr.msra.gmra.mrb[0].mxu0 %v470_v42 }
  0xab   : > { %2591 = vmatpush3.bf16.msra.mxu0 %v2588_v32  ;;  %2410 = vmatprep.mubr.f32.mxu0 %v461_v39  ;;  %v2656_v32 = vpack.c.bf16 %v1073_v23, %v1066_v22 }
  0xac   : > { %2593 = vmatprep.subr.bf16.mxu0 %v2592_v33 }
  0xaf   : > { %2595 = vmatpush3.bf16.msra.mxu0 %v2592_v33 }
  0xb0   : > { %2597 = vmatprep.subr.bf16.mxu0 %v2873_v11 }
  0xb2   : > { %2411 = vmatmul.mubr.f32.vlgmr.msra.gmra.mrb[0].mxu0 %v471_v44 }
  0xb3   : > { %2599 = vmatpush3.bf16.msra.mxu0 %v2873_v11  ;;  %2421 = vmatprep.mubr.f32.mxu0 %v462_v43 }
  0xb4   : > { %2601 = vmatprep.subr.bf16.mxu0 %v2880_v17 }
  0xb7   : > { %2603 = vmatpush3.bf16.msra.mxu0 %v2880_v17 }
  0xb8   : > { %2605 = vmatprep.subr.bf16.mxu0 %v2604_v34 }
  0xba   : > { %2422 = vmatmul.mubr.f32.vlgmr.msra.gmra.mrb[0].mxu0 %v472_v46 }
  0xbb   : > { %2607 = vmatpush3.bf16.msra.mxu0 %v2604_v34  ;;  %2432 = vmatprep.mubr.f32.mxu0 %v460_v38 }
  0xbc   : > { %2609 = vmatprep.subr.bf16.mxu0 %v2608_v35 }
  0xbf   : > { %2611 = vmatpush3.bf16.msra.mxu0 %v2608_v35 }
  0xc0   : > { %2613 = vmatprep.subr.bf16.mxu0 %v2873_v11 }
  0xc2   : > { %2433 = vmatmul.mubr.f32.vlgmr.msra.gmra.mrb[0].mxu0 %v470_v42 }
  0xc3   : > { %2615 = vmatpush3.bf16.msra.mxu0 %v2873_v11  ;;  %2443 = vmatprep.mubr.f32.mxu0 %v460_v38  ;;  %v1058_v11 = vsub.f32 %v952_v60, %v964_v62  ;;  %v1499_v62 = vld [vmem:[%s3012_s5 + $0x8] sm:$0xff] }
  0xc4   : > { %2617 = vmatprep.subr.bf16.mxu0 %v2880_v17 }
  0xc5   : > { %v1059_v13 = vand.u32 4294901760, %v1058_v11  ;;  %v2636_v29 = vpack.c.bf16 %v1058_v11, %v1051_v10  ;;  %v1526_v10 = vsel %vm384_vm0, %v1495_v7, 0 }
  0xc7   : > { %2619 = vmatpush3.bf16.msra.mxu0 %v2880_v17  ;;  %v1060_v15 = vsub.f32 %v1058_v11, %v1059_v13  ;;  %v1054_v17 = vand.u32 4294901760, %v1053_v14  ;;  %v2652_v31 = vpack.c.bf16 %v1059_v13, %v1052_v12  ;;  %v1497_v12 = vld [vmem:[%s3011_s4 + $0x18] sm:$0xff]  ;;  %v2965_v13 = vand.u32 4294901760, %v1526_v10 }
  0xc9   : > { %v1061_v18 = vand.u32 4294901760, %v1060_v15  ;;  %v1532_v15 = vsel %vm384_vm0, %v1497_v12, 0  ;;  %v1618_v22 = vsub.f32 %v1526_v10, %v2965_v13 }
  0xca   : > { %2444 = vmatmul.mubr.f32.vlgmr.msra.gmra.mrb[0].mxu0 %v470_v42  ;;  %v1637_v23 = vand.u32 4294901760, %v1532_v15 }
  0xcb   : > { %v2628_v19 = vpack.c.bf16 %v1061_v18, %v1054_v17 }
  0xcd   : > { %2629 = vmatprep.subr.bf16.mxu1 %v2628_v19 }
 0x19d   : > { %v2445_v51 = vpop.f32.mrb[0].mxu0 }
 0x19e   : > { %v2692_v52 = vadd.f32 %v2445_v51, %v2265_v50  ;;  %v909_v53 = vpop.f32.mrb[1].mxu0 }
 0x19f   : > { %v2693_v54 = vadd.f32 %v2265_v50, %v909_v53 }
 0x1a0   : > { %v923_v56 = vsel %vm919_vm1, %v2692_v52, -inf }
 0x1a1   : > { %v920_v55 = vsel %vm919_vm1, %v2693_v54, -inf }
 0x1a2   : > { %921 = vmax.xlane.f32.xlu1 %v920_v55  ;;  %v1494_v55 = vld [vmem:[%s3011_s4] sm:$0xff] }
 0x1a6   : > { %924 = vmax.xlane.f32.xlu1 %v923_v56  ;;  %v1523_v56 = vsel %vm384_vm0, %v1494_v55, 0 }
 0x1a7   : > { %v2933_v57 = vand.u32 4294901760, %v1523_v56 }
 0x1a9   : > { %v2936_v58 = vsub.f32 %v1523_v56, %v2933_v57 }
 0x1ab   : > { %v1609_v59 = vand.u32 4294901760, %v2936_v58 }
 0x1ad   : > { %v1610_v60 = vsub.f32 %v2936_v58, %v1609_v59 }
 0x1af   : > { %v1611_v61 = vand.u32 4294901760, %v1610_v60 }
 0x1b1   : > { %2516 = vmatprep.mubr.f32.mxu0 %v1611_v61 }
 0x22f   : > { %v922_v33 = vpop.xlane.xlu1 %921 }
 0x230   : > { %v926_v34 = vsub.f32 %v2693_v54, %v922_v33 }
 0x232   : > { %v928_v35 = vmul.f32 1.442695, %v926_v34 }
 0x233   : > { %v925_v36 = vpop.xlane.xlu1 %924 }
 0x234   : > { %2766 = vpow2.f32 %v928_v35  ;;  %v927_v37 = vsub.f32 %v2692_v52, %v925_v36 }
 0x236   : > { %v930_v38 = vmul.f32 1.442695, %v927_v37 }
 0x238   : > { %2768 = vpow2.f32 %v930_v38 }
 0x23e   : > { %v2767_v39 = vpop.eup %2766 }
 0x23f   : > { %v932_v40 = vsel %vm919_vm1, %v2767_v39, 0.0  ;;  %v943_v41 = vsel %vm919_vm1, %v2767_v39, 0 }
 0x240   : > { %933 = vadd.xlane.f32.xlu1 %v932_v40  ;;  %v1029_v42 = vand.u32 4294901760, %v943_v41 }
 0x242   : > { %v2769_v43 = vpop.eup %2768  ;;  %v1030_v44 = vsub.f32 %v943_v41, %v1029_v42 }
 0x243   : > { %v935_v45 = vsel %vm919_vm1, %v2769_v43, 0.0  ;;  %v946_v46 = vsel %vm919_vm1, %v2769_v43, 0 }
 0x244   : > { %936 = vadd.xlane.f32.xlu1 %v935_v45  ;;  %v1031_v47 = vand.u32 4294901760, %v1030_v44  ;;  %v1039_v48 = vand.u32 4294901760, %v946_v46 }
 0x246   : > { %v1032_v49 = vsub.f32 %v1030_v44, %v1031_v47  ;;  %v1040_v50 = vsub.f32 %v946_v46, %v1039_v48 }
 0x248   : > { %v1033_v51 = vand.u32 4294901760, %v1032_v49  ;;  %v1041_v52 = vand.u32 4294901760, %v1040_v50 }
 0x24a   : > { %2454 = vmatprep.mubr.f32.mxu1 %v1033_v51  ;;  %v1042_v53 = vsub.f32 %v1040_v50, %v1041_v52 }
 0x24c   : > { %v1043_v54 = vand.u32 4294901760, %v1042_v53 }
 0x24e   : > { %2455 = vmatmul.mubr.f32.vlgmr.msra.gmra.mrb[0].mxu1 %v1043_v54 }
 0x24f   : > { %2631 = vmatpush3.bf16.xpose.msra.mxu1 %v2628_v19  ;;  %2465 = vmatprep.mubr.f32.mxu1 %v1029_v42 }
 0x250   : > { %2633 = vmatprep.subr.bf16.mxu1 %v2632_v28 }
 0x257   : > { %2635 = vmatpush3.bf16.xpose.msra.mxu1 %v2632_v28 }
 0x258   : > { %2637 = vmatprep.subr.bf16.mxu1 %v2636_v29 }
 0x25e   : > { %2466 = vmatmul.mubr.f32.vlgmr.msra.gmra.mrb[0].mxu1 %v1039_v48 }
 0x25f   : > { %2639 = vmatpush3.bf16.xpose.msra.mxu1 %v2636_v29  ;;  %2476 = vmatprep.mubr.f32.mxu1 %v1030_v44 }
 0x260   : > { %2641 = vmatprep.subr.bf16.mxu1 %v2640_v30 }
 0x267   : > { %2643 = vmatpush3.bf16.xpose.msra.mxu1 %v2640_v30  ;;  %v1619_v30 = vand.u32 4294901760, %v1618_v22 }
 0x268   : > { %2645 = vmatprep.subr.bf16.mxu1 %v2907_v63 }
 0x269   : > { %v1620_v38 = vsub.f32 %v1618_v22, %v1619_v30 }
 0x26b   : > { %v1621_v46 = vand.u32 4294901760, %v1620_v38 }
 0x26e   : > { %2477 = vmatmul.mubr.f32.vlgmr.msra.gmra.mrb[0].mxu1 %v1040_v50 }
 0x26f   : > { %2647 = vmatpush3.bf16.xpose.msra.mxu1 %v2907_v63  ;;  %2487 = vmatprep.mubr.f32.mxu1 %v1031_v47 }
 0x270   : > { %2649 = vmatprep.subr.bf16.mxu1 %v2913_v8 }
 0x277   : > { %2651 = vmatpush3.bf16.xpose.msra.mxu1 %v2913_v8 }
 0x278   : > { %2653 = vmatprep.subr.bf16.mxu1 %v2652_v31 }
 0x27e   : > { %2488 = vmatmul.mubr.f32.vlgmr.msra.gmra.mrb[0].mxu1 %v1041_v52 }
 0x27f   : > { %2655 = vmatpush3.bf16.xpose.msra.mxu1 %v2652_v31  ;;  %2498 = vmatprep.mubr.f32.mxu1 %v1029_v42  ;;  %v1638_v31 = vsub.f32 %v1532_v15, %v1637_v23 }
 0x280   : > { %2657 = vmatprep.subr.bf16.mxu1 %v2656_v32 }
 0x281   : > { %v1639_v40 = vand.u32 4294901760, %v1638_v31 }
 0x287   : > { %2659 = vmatpush3.bf16.xpose.msra.mxu1 %v2656_v32 }
 0x288   : > { %2661 = vmatprep.subr.bf16.mxu1 %v2907_v63 }
 0x28e   : > { %2499 = vmatmul.mubr.f32.vlgmr.msra.gmra.mrb[0].mxu1 %v1039_v48 }
 0x28f   : > { %2663 = vmatpush3.bf16.xpose.msra.mxu1 %v2907_v63  ;;  %2509 = vmatprep.mubr.f32.mxu1 %v1029_v42  ;;  %v2798_v63 = vmov 0  }
 0x290   : > { %2665 = vmatprep.subr.bf16.mxu1 %v2913_v8  ;;  %2765 = vset.pattern.permute.xlu1 %v2798_v63 }
 0x291   : > { %2764 = vset.pattern.permute.xlu0 %v2798_v63  ;;  %1509 = vperm.xlu1 %2765, %v1499_v62  }
 0x292   : > { %1504 = vperm.xlu0 %2764, %v1498_v1  }
 0x295   : > { %1514 = vperm.xlu1 %2765, %v1500_v2  }
 0x297   : > { %2667 = vmatpush3.bf16.xpose.msra.mxu1 %v2913_v8  ;;  %v1496_v8 = vld [vmem:[%s3011_s4 + $0x10] sm:$0xff] }
 0x298   : > { %v1529_v11 = vsel %vm384_vm0, %v1496_v8, 0 }
 0x299   : > { %1519 = vperm.xlu1 %2765, %v1501_v3   ;;  %v2967_v14 = vand.u32 4294901760, %v1529_v11 }
 0x29b   : > { %v1628_v25 = vsub.f32 %v1529_v11, %v2967_v14 }
 0x29d   : > { %v1629_v33 = vand.u32 4294901760, %v1628_v25 }
 0x29e   : > { %2510 = vmatmul.mubr.f32.vlgmr.msra.gmra.mrb[0].mxu1 %v1039_v48  ;;  %v1640_v48 = vsub.f32 %v1638_v31, %v1639_v40 }
 0x29f   : > { %v1630_v42 = vsub.f32 %v1628_v25, %v1629_v33 }
 0x2a0   : > { %v1641_v51 = vand.u32 4294901760, %v1640_v48 }
 0x2a1   : > { %v1631_v49 = vand.u32 4294901760, %v1630_v42 }
 0x2cd   : > { %v934_v4 = vpop.xlane.xlu1 %933 }
 0x2d1   : > { %v937_v5 = vpop.xlane.xlu1 %936 }
 0x2d2   : > { %2770 = vrcp.f32 %v937_v5 }
 0x2d3   : > { %2772 = vrcp.f32 %v934_v4 }
 0x2dc   : > { %v2771_v17 = vpop.eup %2770 }
 0x2dd   : > { %v2773_v19 = vpop.eup %2772 }
 0x310   : > { %v1510_v52 = vpop.permute.xlu1 %1509 }
 0x311   : > { %v1505_v54 = vpop.permute.xlu0 %1504 }
 0x314   : > { %v1515_v53 = vpop.permute.xlu1 %1514 }
 0x318   : > { %v1520_v61 = vpop.permute.xlu1 %1519 }
 0x371   : > { %v2511_v18 = vpop.f32.mrb[0].mxu1 }
 0x372   : > { %v1493_v20 = vmul.f32 %v2771_v17, %v2511_v18  ;;  %v1478_v21 = vpop.f32.mrb[1].mxu1 }
 0x373   : > { %v1492_v24 = vmul.f32 %v2773_v19, %v1478_v21 }
 0x374   : > { %v1538_v26 = vsel %vm384_vm0, %v1493_v20, 0 }
 0x375   : > { %v1544_v27 = vand.u32 4294901760, %v1538_v26  ;;  %v1535_v28 = vsel %vm384_vm0, %v1492_v24, 0 }
 0x376   : > { %v1541_v29 = vand.u32 4294901760, %v1535_v28 }
 0x377   : > { %v1656_v32 = vsub.f32 %v1538_v26, %v1544_v27 }
 0x378   : > { %v2668_v34 = vpack.c.bf16 %v1544_v27, %v1541_v29  ;;  %v1649_v35 = vsub.f32 %v1535_v28, %v1541_v29 }
 0x379   : > { %v1657_v36 = vand.u32 4294901760, %v1656_v32 }
 0x37a   : > { %v1650_v37 = vand.u32 4294901760, %v1649_v35  ;;  %2669 = vmatprep.subr.bf16.mxu0 %v2668_v34  ;;  %v2676_v39 = vpack.c.bf16 %v1656_v32, %v1649_v35 }
 0x37b   : > { %2671 = vmatpush3.bf16.xpose.msra.mxu0 %v2668_v34  ;;  %v1658_v41 = vsub.f32 %v1656_v32, %v1657_v36 }
 0x37c   : > { %v1651_v43 = vsub.f32 %v1649_v35, %v1650_v37  ;;  %v2684_v44 = vpack.c.bf16 %v1657_v36, %v1650_v37 }
 0x37d   : > { %v1659_v45 = vand.u32 4294901760, %v1658_v41 }
 0x37e   : > { %v1652_v47 = vand.u32 4294901760, %v1651_v43 }
 0x380   : > { %v2672_v50 = vpack.c.bf16 %v1659_v45, %v1652_v47 }
 0x382   : > { %2517 = vmatmul.mubr.f32.vlgmr.msra.gmra.mrb[2].mxu0 %v1621_v46  ;;  %2673 = vmatprep.subr.bf16.mxu0 %v2672_v50 }
 0x383   : > { %2675 = vmatpush3.bf16.xpose.msra.mxu0 %v2672_v50  ;;  %2519 = vmatprep.mubr.f32.mxu0 %v1631_v49 }
 0x384   : > { %2677 = vmatprep.subr.bf16.mxu0 %v2676_v39 }
 0x386   : > { %2520 = vmatmul.mubr.f32.gmra.mrb[4].mxu0 %v1641_v51 }
 0x387   : > { %2526 = vmatprep.mubr.f32.mxu0 %v2933_v57 }
 0x38a   : > { %2527 = vmatmul.mubr.f32.vlgmr.msra.gmra.mrb[2].mxu0 %v2965_v13 }
 0x38b   : > { %2679 = vmatpush3.bf16.xpose.msra.mxu0 %v2676_v39  ;;  %2529 = vmatprep.mubr.f32.mxu0 %v2967_v14 }
 0x38c   : > { %2681 = vmatprep.subr.bf16.mxu0 %v2668_v34 }
 0x38e   : > { %2530 = vmatmul.mubr.f32.gmra.mrb[4].mxu0 %v1637_v23 }
 0x38f   : > { %2536 = vmatprep.mubr.f32.mxu0 %v2936_v58 }
 0x392   : > { %2537 = vmatmul.mubr.f32.vlgmr.msra.gmra.mrb[2].mxu0 %v1618_v22 }
 0x393   : > { %2683 = vmatpush3.bf16.xpose.msra.mxu0 %v2668_v34  ;;  %2539 = vmatprep.mubr.f32.mxu0 %v1628_v25 }
 0x394   : > { %2685 = vmatprep.subr.bf16.mxu0 %v2684_v44 }
 0x396   : > { %2540 = vmatmul.mubr.f32.gmra.mrb[4].mxu0 %v1638_v31 }
 0x397   : > { %2546 = vmatprep.mubr.f32.mxu0 %v1609_v59 }
 0x39a   : > { %2547 = vmatmul.mubr.f32.vlgmr.msra.gmra.mrb[2].mxu0 %v1619_v30 }
 0x39b   : > { %2687 = vmatpush3.bf16.xpose.msra.mxu0 %v2684_v44  ;;  %2549 = vmatprep.mubr.f32.mxu0 %v1629_v33 }
 0x39c   : > { %2689 = vmatprep.subr.bf16.mxu0 %v2668_v34 }
 0x39e   : > { %2550 = vmatmul.mubr.f32.gmra.mrb[4].mxu0 %v1639_v40 }
 0x39f   : > { %2556 = vmatprep.mubr.f32.mxu0 %v2933_v57 }
 0x3a2   : > { %2557 = vmatmul.mubr.f32.vlgmr.msra.gmra.mrb[2].mxu0 %v2965_v13 }
 0x3a3   : > { %2691 = vmatpush3.bf16.xpose.msra.mxu0 %v2668_v34  ;;  %2559 = vmatprep.mubr.f32.mxu0 %v2967_v14 }
 0x3a6   : > { %2560 = vmatmul.mubr.f32.gmra.mrb[4].mxu0 %v1637_v23 }
 0x3a7   : > { %2566 = vmatprep.mubr.f32.mxu0 %v2933_v57 }
 0x3aa   : > { %2567 = vmatmul.mubr.f32.vlgmr.msra.gmra.mrb[2].mxu0 %v2965_v13 }
 0x3ab   : > { %2569 = vmatprep.mubr.f32.mxu0 %v2967_v14 }
 0x3ae   : > { %2570 = vmatmul.mubr.f32.gmra.mrb[4].mxu0 %v1637_v23 }
 0x47d   : > { %v2568_v55 = vpop.f32.mrb[2].mxu0 }
 0x47e   : > { %v2694_v56 = vadd.f32 %v2568_v55, %v1510_v52  ;;  %v2106_v58 = vpop.f32.mrb[3].mxu0 }
 0x47f   : > { %v2695_v59 = vadd.f32 %v2106_v58, %v1505_v54 }
 0x480   : > { %v2129_v60 = vadd.f32 %v2694_v56, %v2868_v6 }
 0x481   : > { %v2128_v57 = vadd.f32 %v2695_v59, %v2865_v0  ;;  %v2571_v62 = vpop.f32.mrb[4].mxu0 }
 0x482   : > { %2133 = vst.msk [vmem:[%s336_s12 + $0x8] sm:$0xff] %vm919_vm1, %v2129_v60  ;;  %v2696_v63 = vadd.f32 %v2571_v62, %v1520_v61  ;;  %v2118_v1 = vpop.f32.mrb[5].mxu0 }
 0x483   : > { %2132 = vst.msk [vmem:[%s336_s12] sm:$0xff] %vm919_vm1, %v2128_v57  ;;  %v2697_v2 = vadd.f32 %v2118_v1, %v1515_v53 }
 0x484   : > { %v2131_v3 = vadd.f32 %v2696_v63, %v2877_v16 }
 0x485   : > { %v2130_v4 = vadd.f32 %v2697_v2, %v2871_v9 }
 0x486   : > { %2135 = vst.msk [vmem:[%s336_s12 + $0x18] sm:$0xff] %vm919_vm1, %v2131_v3 }
 0x487   : > { %2134 = vst.msk [vmem:[%s336_s12 + $0x10] sm:$0xff] %vm919_vm1, %v2130_v4 }
 0x488 PF: > { %s16_s23 = sadd.s32 1, %s2796_s23   ;;  %s3014_s21 = smov %s2792_s22 }
 0x489   : > { %p13_p5 = scmp.ge.s32.totalorder %s16_s23, 4   ;;  %s3015_s22 = smov %s3017_s24 }
 0x48b   :  { %15 = sbr.rel (!%p13_p5) target bundleno = 2 (0x2), region = 83 }

</bundles_post_ra>
